<compile_context>
chip_gen: v6e
topology: v6e:2x2x1
jax: 0.10.0
libtpu: 0.0.40
codegen_flags: <defaults>
</compile_context>

<pallas_src>
import jax
import jax.numpy as jnp
from jax.experimental import pallas as pl
from jax.experimental.pallas import tpu as pltpu

N_EMBED = 32
N_HEADS = 4
IN_LEN = N_EMBED * N_HEADS          # 128
OUT_LEN = N_EMBED + 1               # 33
GATE_WIDTH = 2 * N_EMBED            # 64: [resid | replicated gate column]
RESID_GATE_MULTIPLIER = 2.0


def gated_ff_kernel(x_ref, w1_ref, b1_ref, w2_ref, b2_ref, o_ref):
    """Fused: Linear -> GELU -> Linear(lane-aligned gated head) -> gate*resid."""
    x = x_ref[...]                                                # (TM, 128) bf16
    # MXU matmul in bf16, f32 accumulation; elementwise math in f32.
    h = jnp.dot(x, w1_ref[...], preferred_element_type=jnp.float32) + b1_ref[...]
    h = jax.nn.gelu(h, approximate=True)                          # tanh-form GELU (EUP)
    out = jnp.dot(h.astype(jnp.bfloat16), w2_ref[...],
                  preferred_element_type=jnp.float32) + b2_ref[...]  # (TM, 64)
    resid = out[:, :N_EMBED]                                      # (TM, 32) static slice
    # Gate column was replicated into lanes 32..63 by the wrapper -> pure VPU.
    gate = jax.nn.sigmoid(out[:, N_EMBED:]) * RESID_GATE_MULTIPLIER
    # TODO(synk): dropout on `resid` omitted (eval-mode identity).
    o_ref[...] = (resid * gate).astype(o_ref.dtype)


def _round_up(x, m):
    return ((x + m - 1) // m) * m


def gated_feed_forward(x, w1, b1, w2, b2, *, tile_m=None):
    """x: (B, S, H, E) float32.  Returns (B, S, E) float32."""
    B, S, H, E = x.shape
    assert H * E == IN_LEN and E == N_EMBED
    N = B * S

    # --- parameter prep (done once in the wrapper, outside the kernel) -------
    # Fold the single gate output column into a lane-aligned 64-wide head:
    #   W2' = [ W2[:, :E] | tile(W2[:, E:E+1], E) ],  b2' likewise.
    w2_fused = jnp.concatenate(
        [w2[:, :N_EMBED], jnp.tile(w2[:, N_EMBED:OUT_LEN], (1, N_EMBED))], axis=1)
    b2_fused = jnp.concatenate(
        [b2[:N_EMBED], jnp.tile(b2[N_EMBED:OUT_LEN], (N_EMBED,))])

    x2 = x.reshape(N, IN_LEN).astype(jnp.bfloat16)      # bf16 matmul operands
    w1_bf = w1.astype(jnp.bfloat16)
    w2_bf = w2_fused.astype(jnp.bfloat16)
    b1_2d = b1.reshape(1, IN_LEN).astype(jnp.float32)   # biases stay f32
    b2_2d = b2_fused.reshape(1, GATE_WIDTH).astype(jnp.float32)

    # --- tile selection -------------------------------------------------------
    if tile_m is None:
        if N <= 1024:
            tile_m = N                                   # single step at small N
        else:
            # Large tiles, but keep >=4 grid steps so v7x's 2 TCs both get work.
            tile_m = min(4096, _round_up(pl.cdiv(N, 4), 8))
    tile_m = max(1, min(tile_m, N))

    grid = (pl.cdiv(N, tile_m),)
    out2 = pl.pallas_call(
        gated_ff_kernel,
        out_shape=jax.ShapeDtypeStruct((N, N_EMBED), jnp.float32),
        grid_spec=pltpu.PrefetchScalarGridSpec(
            num_scalar_prefetch=0,
            grid=grid,
            in_specs=[
                pl.BlockSpec((tile_m, IN_LEN), lambda i: (i, 0)),      # x rows (bf16)
                pl.BlockSpec((IN_LEN, IN_LEN), lambda i: (0, 0)),      # W1 resident
                pl.BlockSpec((1, IN_LEN), lambda i: (0, 0)),           # b1
                pl.BlockSpec((IN_LEN, GATE_WIDTH), lambda i: (0, 0)),  # W2' resident
                pl.BlockSpec((1, GATE_WIDTH), lambda i: (0, 0)),       # b2'
            ],
            out_specs=pl.BlockSpec((tile_m, N_EMBED), lambda i: (i, 0)),
        ),
        compiler_params=pltpu.CompilerParams(
            dimension_semantics=("parallel",)),
    )(x2, w1_bf, b1_2d, w2_bf, b2_2d)
    return out2.reshape(B, S, N_EMBED)


def reference(x, w1, b1, w2, b2):
    """Pure-JAX f32 reference of the module forward (same tanh-GELU contract)."""
    B, S, H, E = x.shape
    x2 = x.reshape(B, S, H * E)
    h = jax.nn.gelu(x2 @ w1 + b1, approximate=True)
    out = h @ w2 + b2
    resid = out[..., :-1]
    gate = jax.nn.sigmoid(out[..., -1]) * RESID_GATE_MULTIPLIER
    return resid * gate[..., None]


if __name__ == "__main__":
    key = jax.random.PRNGKey(0)
    kx, kw1, kb1, kw2, kb2 = jax.random.split(key, 5)

    B, S = 2, 8
    x = jax.random.normal(kx, (B, S, N_HEADS, N_EMBED), dtype=jnp.float32)

    # Deterministic parameter init (PyTorch nn.Linear stores weight as (out, in);
    # we build (in, out) mats directly, which is the same math).
    scale1 = 1.0 / (IN_LEN ** 0.5)
    w1 = jax.random.uniform(kw1, (IN_LEN, IN_LEN), jnp.float32, -scale1, scale1)
    b1 = jax.random.uniform(kb1, (IN_LEN,), jnp.float32, -scale1, scale1)
    w2 = jax.random.uniform(kw2, (IN_LEN, OUT_LEN), jnp.float32, -scale1, scale1)
    b2 = jax.random.uniform(kb2, (OUT_LEN,), jnp.float32, -scale1, scale1)

    out = gated_feed_forward(x, w1, b1, w2, b2)
    jax.block_until_ready(out)

    ref = reference(x, w1, b1, w2, b2)
    assert out.shape == (B, S, N_EMBED)
    # bf16 matmul operands -> loosened tolerance vs. the f32 reference.
    assert jnp.allclose(out, ref, atol=3e-2, rtol=3e-2), float(
        jnp.max(jnp.abs(out - ref)))

    print("KERNEL_OK")
</pallas_src>

<mosaic_0001>
module attributes {stable_mosaic.version = 11 : i64} {
  func.func @gated_ff_kernel(%arg0: i32, %arg1: memref<16x128xbf16, #tpu.memory_space<vmem>>, %arg2: memref<128x128xbf16, #tpu.memory_space<vmem>>, %arg3: memref<1x128xf32, #tpu.memory_space<vmem>>, %arg4: memref<128x64xbf16, #tpu.memory_space<vmem>>, %arg5: memref<1x64xf32, #tpu.memory_space<vmem>>, %arg6: memref<16x32xf32, #tpu.memory_space<vmem>>) attributes {dimension_semantics = [#tpu.dimension_semantics<parallel>], iteration_bounds = array<i64: 1>, scalar_prefetch = 0 : i64, scratch_operands = 0 : i64, tpu.core_type = #tpu.core_type<tc>, window_params = [{transform_indices = @transform_0, window_bounds = array<i64: 16, 128>}, {pipeline_mode = #tpu.pipeline_mode<synchronous>, transform_indices = @transform_1, window_bounds = array<i64: 128, 128>}, {pipeline_mode = #tpu.pipeline_mode<synchronous>, transform_indices = @transform_2, window_bounds = array<i64: 1, 128>}, {pipeline_mode = #tpu.pipeline_mode<synchronous>, transform_indices = @transform_3, window_bounds = array<i64: 128, 64>}, {pipeline_mode = #tpu.pipeline_mode<synchronous>, transform_indices = @transform_4, window_bounds = array<i64: 1, 64>}, {transform_indices = @transform_5, window_bounds = array<i64: 16, 32>}]} {
    %c0 = arith.constant 0 : index
    %c0_0 = arith.constant 0 : index
    %0 = vector.load %arg1[%c0, %c0_0] : memref<16x128xbf16, #tpu.memory_space<vmem>>, vector<16x128xbf16>
    %c0_1 = arith.constant 0 : index
    %c0_2 = arith.constant 0 : index
    %1 = vector.load %arg2[%c0_1, %c0_2] : memref<128x128xbf16, #tpu.memory_space<vmem>>, vector<128x128xbf16>
    %cst = arith.constant dense<0.000000e+00> : vector<16x128xf32>
    %2 = tpu.matmul %0, %1, %cst {dimension_numbers = #tpu.dot_dimension_numbers<[1], [0], [0], [1], [0, 0, 1, 1], [], []>} : vector<16x128xbf16>, vector<128x128xbf16>, vector<16x128xf32> -> vector<16x128xf32>
    %c0_3 = arith.constant 0 : index
    %c0_4 = arith.constant 0 : index
    %3 = vector.load %arg3[%c0_3, %c0_4] : memref<1x128xf32, #tpu.memory_space<vmem>>, vector<1x128xf32>
    %4 = vector.broadcast %3 : vector<1x128xf32> to vector<16x128xf32>
    %5 = arith.addf %2, %4 : vector<16x128xf32>
    %6 = arith.mulf %5, %5 : vector<16x128xf32>
    %7 = arith.mulf %5, %6 : vector<16x128xf32>
    %cst_5 = arith.constant 4.471500e-02 : f32
    %8 = vector.broadcast %cst_5 : f32 to vector<16x128xf32>
    %9 = arith.mulf %8, %7 : vector<16x128xf32>
    %10 = arith.addf %5, %9 : vector<16x128xf32>
    %cst_6 = arith.constant 0.797884583 : f32
    %11 = vector.broadcast %cst_6 : f32 to vector<16x128xf32>
    %12 = arith.mulf %11, %10 : vector<16x128xf32>
    %13 = math.tanh %12 : vector<16x128xf32>
    %cst_7 = arith.constant 1.000000e+00 : f32
    %14 = vector.broadcast %cst_7 : f32 to vector<16x128xf32>
    %15 = arith.addf %14, %13 : vector<16x128xf32>
    %cst_8 = arith.constant 5.000000e-01 : f32
    %16 = vector.broadcast %cst_8 : f32 to vector<16x128xf32>
    %17 = arith.mulf %16, %15 : vector<16x128xf32>
    %18 = arith.mulf %5, %17 : vector<16x128xf32>
    %19 = arith.truncf %18 : vector<16x128xf32> to vector<16x128xbf16>
    %c0_9 = arith.constant 0 : index
    %c0_10 = arith.constant 0 : index
    %20 = vector.load %arg4[%c0_9, %c0_10] : memref<128x64xbf16, #tpu.memory_space<vmem>>, vector<128x64xbf16>
    %cst_11 = arith.constant dense<0.000000e+00> : vector<16x64xf32>
    %21 = tpu.matmul %19, %20, %cst_11 {dimension_numbers = #tpu.dot_dimension_numbers<[1], [0], [0], [1], [0, 0, 1, 1], [], []>} : vector<16x128xbf16>, vector<128x64xbf16>, vector<16x64xf32> -> vector<16x64xf32>
    %c0_12 = arith.constant 0 : index
    %c0_13 = arith.constant 0 : index
    %22 = vector.load %arg5[%c0_12, %c0_13] : memref<1x64xf32, #tpu.memory_space<vmem>>, vector<1x64xf32>
    %23 = vector.broadcast %22 : vector<1x64xf32> to vector<16x64xf32>
    %24 = arith.addf %21, %23 : vector<16x64xf32>
    %25 = vector.extract_strided_slice %24 {offsets = [0, 0], sizes = [16, 32], strides = [1, 1]} : vector<16x64xf32> to vector<16x32xf32>
    %26 = vector.extract_strided_slice %24 {offsets = [0, 32], sizes = [16, 32], strides = [1, 1]} : vector<16x64xf32> to vector<16x32xf32>
    %27 = arith.negf %26 : vector<16x32xf32>
    %28 = math.exp %27 : vector<16x32xf32>
    %cst_14 = arith.constant 1.000000e+00 : f32
    %29 = vector.broadcast %cst_14 : f32 to vector<16x32xf32>
    %30 = arith.addf %29, %28 : vector<16x32xf32>
    %31 = arith.divf %29, %30 : vector<16x32xf32>
    %cst_15 = arith.constant 2.000000e+00 : f32
    %32 = vector.broadcast %cst_15 : f32 to vector<16x32xf32>
    %33 = arith.mulf %31, %32 : vector<16x32xf32>
    %34 = arith.mulf %25, %33 : vector<16x32xf32>
    %c0_16 = arith.constant 0 : index
    %c0_17 = arith.constant 0 : index
    %35 = vector.load %arg6[%c0_16, %c0_17] : memref<16x32xf32, #tpu.memory_space<vmem>>, vector<16x32xf32>
    tpu.vector_store %arg6[%c0_16, %c0_17], %34 {strides = array<i32>} : memref<16x32xf32, #tpu.memory_space<vmem>>, vector<16x32xf32>,
    return
  }
  func.func @transform_0(%arg0: i32) -> (i32, i32) {
    %c0_i32 = arith.constant 0 : i32
    %c0_i32_0 = arith.constant 0 : i32
    return %arg0, %c0_i32 : i32, i32
  }
  func.func @transform_1(%arg0: i32) -> (i32, i32) {
    %c0_i32 = arith.constant 0 : i32
    %c0_i32_0 = arith.constant 0 : i32
    %c0_i32_1 = arith.constant 0 : i32
    return %c0_i32, %c0_i32_0 : i32, i32
  }
  func.func @transform_2(%arg0: i32) -> (i32, i32) {
    %c0_i32 = arith.constant 0 : i32
    %c0_i32_0 = arith.constant 0 : i32
    %c0_i32_1 = arith.constant 0 : i32
    return %c0_i32, %c0_i32_0 : i32, i32
  }
  func.func @transform_3(%arg0: i32) -> (i32, i32) {
    %c0_i32 = arith.constant 0 : i32
    %c0_i32_0 = arith.constant 0 : i32
    %c0_i32_1 = arith.constant 0 : i32
    return %c0_i32, %c0_i32_0 : i32, i32
  }
  func.func @transform_4(%arg0: i32) -> (i32, i32) {
    %c0_i32 = arith.constant 0 : i32
    %c0_i32_0 = arith.constant 0 : i32
    %c0_i32_1 = arith.constant 0 : i32
    return %c0_i32, %c0_i32_0 : i32, i32
  }
  func.func @transform_5(%arg0: i32) -> (i32, i32) {
    %c0_i32 = arith.constant 0 : i32
    %c0_i32_0 = arith.constant 0 : i32
    return %arg0, %c0_i32 : i32, i32
  }
}

</mosaic_0001>

<bundles_post_ra>
// kernel: tpu_custom_call.1
= control target key start
LH: loop header
LB: loop body
LE: loop exit
PB: predicated region body
PF: predicated region fallthrough
CT: control target
= control target key end

     0   :  { %v452_v1 = vmov 0.0   ;;  %vm453_vm0 = vmmov 0   ;;  %s548_s0 = inlined_call_operand.vmem [shape: bf16[16,128], index: 0, kind: input, shape index: {}]   ;;  %s549_s1 = inlined_call_operand.vmem [shape: bf16[128,128], index: 1, kind: input, shape index: {}]   ;;  %s550_s2 = inlined_call_operand.vmem [shape: f32[1,128], index: 2, kind: input, shape index: {}]   ;;  %s551_s3 = inlined_call_operand.vmem [shape: bf16[128,64], index: 3, kind: input, shape index: {}]   ;;  %s552_s4 = inlined_call_operand.vmem [shape: f32[1,64], index: 4, kind: input, shape index: {}]   ;;  %s553_s5 = inlined_call_operand.hbm [shape: f32[16,32], index: 5, kind: output, shape index: {}]  }
   0x1   :  { %v401_v0 = vld [vmem:[%s549_s1 + $0x38] sm:$0xff]   ;;  %355 = vmatprep.subr.bf16.mxu0 %v452_v1  ;;  %375 = vmatprep.subr.bf16.mxu1 %v452_v1  ;;  %v402_v2 = vld [vmem:[%s549_s1 + $0x30] sm:$0xff]   ;;  %v403_v3 = vld [vmem:[%s549_s1 + $0x28] sm:$0xff]  }
   0x2   :  { %356 = vmatpush3.bf16.msra.mxu0 %v401_v0  ;;  %371 = vmatprep.mubr.msk.bf16.mxu0 %vm453_vm0, %v452_v1  ;;  %v404_v4 = vld [vmem:[%s549_s1 + $0x20] sm:$0xff]   ;;  %v405_v5 = vld [vmem:[%s549_s1 + $0x18] sm:$0xff]  }
   0x3   :  { %357 = vmatprep.subr.bf16.mxu0 %v452_v1  ;;  %391 = vmatprep.mubr.msk.bf16.mxu1 %vm453_vm0, %v452_v1 }
   0x6   :  { %358 = vmatpush3.bf16.msra.mxu0 %v402_v2 }
   0x7   :  { %359 = vmatprep.subr.bf16.mxu0 %v452_v1 }
   0xa   :  { %360 = vmatpush3.bf16.msra.mxu0 %v403_v3 }
   0xb   :  { %361 = vmatprep.subr.bf16.mxu0 %v452_v1 }
   0xe   :  { %362 = vmatpush3.bf16.msra.mxu0 %v404_v4 }
   0xf   :  { %10 = vsyncpa [#allocation3], 0  ;;  %363 = vmatprep.subr.bf16.mxu0 %v452_v1  ;;  %v406_v6 = vld [vmem:[%s549_s1 + $0x10] sm:$0xff]   ;;  %v407_v7 = vld [vmem:[%s549_s1 + $0x8] sm:$0xff]   ;;  %s454_s27 = smov 96   ;;  %vm297_vm1 = vcmask 261120  }
  0x10   :  { %v408_v8 = vld [vmem:[%s549_s1] sm:$0xff]   ;;  %v410_v10 = vld [vmem:[%s551_s3 + $0x38] sm:$0xff]   ;;  %v411_v11 = vld [vmem:[%s551_s3 + $0x30] sm:$0xff]  }
  0x11   :  { %v409_v9 = vld [vmem:[%s548_s0] sm:$0xff]   ;;  %376 = vmatpush3.bf16.msra.mxu1 %v410_v10  ;;  %v412_v12 = vld [vmem:[%s551_s3 + $0x28] sm:$0xff]   ;;  %v414_v14 = vld [vmem:[%s551_s3 + $0x18] sm:$0xff]  }
  0x12   :  { %364 = vmatpush3.bf16.msra.mxu0 %v405_v5  ;;  %377 = vmatprep.subr.bf16.mxu1 %v452_v1  ;;  %v413_v13 = vld [vmem:[%s551_s3 + $0x20] sm:$0xff]   ;;  %v415_v15 = vld [vmem:[%s551_s3 + $0x10] sm:$0xff]   ;;  %v416_v16 = vld [vmem:[%s551_s3 + $0x8] sm:$0xff]  }
  0x13   :  { %365 = vmatprep.subr.bf16.mxu0 %v452_v1  ;;  %v417_v17 = vld [vmem:[%s551_s3] sm:$0xff]  }
  0x14   :  { %v316_v18 = vld [vmem:[%s550_s2] ss:$0 sm:$0xff] }
  0x15   :  { %378 = vmatpush3.bf16.msra.mxu1 %v411_v11  ;;  %v326_v44 = vld [vmem:[%s552_s4] ss:$0 sm:$0xff]  ;;  %s455_s4 = smov [#allocation2]  }
  0x16   :  { %366 = vmatpush3.bf16.msra.mxu0 %v406_v6  ;;  %379 = vmatprep.subr.bf16.mxu1 %v452_v1  ;;  %s305_s28 = sshll.u32 %s455_s4, 4  ;;  %s306_s28 = int_to_ptr.vmem [resolvable:$true] %s305_s28 }
  0x17   :  { %367 = vmatprep.subr.bf16.mxu0 %v452_v1  ;;  %s430_s29 = scalar_lea.vmem %s306_s28, 256  ;;  %p435_p1 = scmp.lt.s32.totalorder %s306_s28, %s306_s28 }
  0x18   :  { %p431_p0 = scmp.ne.s32.totalorder %s306_s28, %s430_s29  ;;  %p436_p2 = scmp.lt.s32.totalorder %s430_s29, %s430_s29 }
  0x19   :  { %380 = vmatpush3.bf16.msra.mxu1 %v412_v12 }
  0x1a   :  { %368 = vmatpush3.bf16.msra.mxu0 %v407_v7  ;;  %381 = vmatprep.subr.bf16.mxu1 %v452_v1  ;;  %p437_p3 = por %p436_p2, %p435_p1 }
  0x1b   :  { %369 = vmatprep.subr.bf16.mxu0 %v452_v1 }
  0x1c   :  { %p438_p4 = pnand %p437_p3, %p431_p0 }
  0x1d   :  { %382 = vmatpush3.bf16.msra.mxu1 %v413_v13 }
  0x1e   :  { %370 = vmatpush3.bf16.msra.mxu0 %v408_v8  ;;  %383 = vmatprep.subr.bf16.mxu1 %v452_v1 }
  0x21   :  { %372 = vmatmul.mubr.bf16.vlgmr.msra.gmra.mxu0 %v409_v9  ;;  %384 = vmatpush3.bf16.msra.mxu1 %v414_v14 }
  0x22   :  { %385 = vmatprep.subr.bf16.mxu1 %v452_v1 }
  0x25   :  { %386 = vmatpush3.bf16.msra.mxu1 %v415_v15 }
  0x26   :  { %387 = vmatprep.subr.bf16.mxu1 %v452_v1 }
  0x29   :  { %388 = vmatpush3.bf16.msra.mxu1 %v416_v16 }
  0x2a   :  { %389 = vmatprep.subr.bf16.mxu1 %v452_v1 }
  0x2d   :  { %390 = vmatpush3.bf16.msra.mxu1 %v417_v17 }
  0xe1   :  { %v135_v19 = vpop.f32.mrf.mxu0 }
  0xe2   :  { %v136_v20 = vadd.f32 %v316_v18, %v135_v19 }
  0xe3   :  { %v373_v21 = vpop.f32.mrf.mxu0 }
  0xe4   :  { %v142_v22 = vmul.f32 %v136_v20, %v136_v20 }
  0xe5   :  { %v138_v23 = vpop.f32.mrf.mxu0 }
  0xe6   :  { %v144_v24 = vmul.f32 %v142_v22, %v136_v20  ;;  %v139_v25 = vadd.f32 %v316_v18, %v138_v23 }
  0xe7   :  { %v374_v26 = vpop.f32.mrf.mxu0 }
  0xe8   :  { %v146_v27 = vmul.f32 0.044715, %v144_v24  ;;  %v143_v28 = vmul.f32 %v139_v25, %v139_v25 }
  0xea   :  { %v148_v29 = vadd.f32 %v146_v27, %v136_v20  ;;  %v145_v30 = vmul.f32 %v143_v28, %v139_v25 }
  0xec   :  { %v150_v31 = vmul.f32 0.7978846, %v148_v29  ;;  %v147_v32 = vmul.f32 0.044715, %v145_v30 }
  0xee   :  { %418 = vtanh.f32 %v150_v31  ;;  %v149_v33 = vadd.f32 %v147_v32, %v139_v25 }
  0xf0   :  { %v151_v34 = vmul.f32 0.7978846, %v149_v33 }
  0xf2   :  { %420 = vtanh.f32 %v151_v34 }
  0xfb   :  { %v419_v35 = vpop.eup %418 }
  0xfc   :  { %v154_v36 = vadd.f32 1.0, %v419_v35 }
  0xfe   :  { %v156_v39 = vmul.f32 0.5, %v154_v36 }
  0xff   :  { %v421_v37 = vpop.eup %420 }
 0x100   :  { %v155_v38 = vadd.f32 1.0, %v421_v37  ;;  %v158_v41 = vmul.f32 %v156_v39, %v136_v20 }
 0x102   :  { %v157_v40 = vmul.f32 0.5, %v155_v38 }
 0x104   :  { %v159_v42 = vmul.f32 %v157_v40, %v139_v25 }
 0x106   :  { %v160_v43 = vpack.c.bf16 %v159_v42, %v158_v41 }
 0x108   :  { %392 = vmatmul.mubr.bf16.vlgmr.msra.gmra.mxu1 %v160_v43 }
 0x1c8   :  { %v266_v45 = vpop.f32.mrf.mxu1 }
 0x1c9   :  { %v267_v46 = vadd.f32 %v326_v44, %v266_v45 }
 0x1ca   :  { %v393_v47 = vpop.f32.mrf.mxu1 }
 0x1cb   :  { %v335_v48 = vmul.f32 -1.442695, %v267_v46 }
 0x1cc   :  { %v269_v49 = vpop.f32.mrf.mxu1 }
 0x1cd   :  { %422 = vpow2.f32 %v335_v48  ;;  %v270_v50 = vadd.f32 %v326_v44, %v269_v49 }
 0x1ce   :  { %v394_v51 = vpop.f32.mrf.mxu1 }
 0x1cf   :  { %v336_v52 = vmul.f32 -1.442695, %v270_v50 }
 0x1d1   :  { %424 = vpow2.f32 %v336_v52 }
 0x1da   :  { %v423_v53 = vpop.eup %422 }
 0x1db   :  { %v279_v54 = vadd.f32 1.0, %v423_v53 }
 0x1dd   :  { %426 = vrcp.f32 %v279_v54 }
 0x1de   :  { %v425_v55 = vpop.eup %424 }
 0x1df   :  { %v280_v56 = vadd.f32 1.0, %v425_v55 }
 0x1e1   :  { %428 = vrcp.f32 %v280_v56 }
 0x1ea   :  { %v427_v57 = vpop.eup %426 }
 0x1eb   :  { %v285_v58 = vmul.f32 2.0, %v427_v57 }
 0x1ed   :  { %289 = vrot.lane.b32.xlu0 %v285_v58, %s454_s27 }
 0x1ee   :  { %v429_v59 = vpop.eup %428 }
 0x1ef   :  { %v286_v60 = vmul.f32 2.0, %v429_v59 }
 0x1f1   :  { %291 = vrot.lane.b32.xlu0 %v286_v60, %s454_s27 }
 0x25f   :  { %v290_v61 = vpop.permute.xlu0 %289 }
 0x260   :  { %v295_v62 = vmul.f32 %v290_v61, %v267_v46 }
 0x262   :  { %298 = vst.msk [vmem:[#allocation2] sm:$0xff] %vm297_vm1, %v295_v62 }
 0x263   :  { %v292_v63 = vpop.permute.xlu0 %291 }
 0x264   :  { %v296_v0 = vmul.f32 %v292_v63, %v270_v50 }
 0x266   :  { %299 = vst.msk [vmem:[#allocation2 + $0x8] sm:$0xff] %vm297_vm1, %v296_v0 }
 0x267   :  { %441 = shalt.err (!%p438_p4)
}
 0x268   :  { %s456_s30 = smov 128   ;;  %s457_s6 = smov 8  }
 0x269   :  { %311 = dma.vmem_to_hbm [thread:$0]  %s306_s28, 256, %s553_s5, [#allocation3], %s456_s30, %s456_s30, %s457_s6  }
 0x26a   :  { %450 = dma.done.wait [#allocation3], 256  }
 0x26b   :  { %451 = vsyncadd [#allocation3], 4294967040 }
 0x26c   :  { %315 = vsyncpa [#allocation3], 1 }

</bundles_post_ra>
